<compile_context>
chip_gen: v7x
topology: tpu7x:2x2x1
jax: 0.10.0
libtpu: 0.0.40
codegen_flags: <defaults>
</compile_context>

<pallas_src>
import math
import functools

import jax
import jax.numpy as jnp
from jax.experimental import pallas as pl
from jax.experimental.pallas import tpu as pltpu

_NEG_BIG = -1e30  # mask value for padded class columns


def _aamsoftmax_kernel(x_ref, w_ref, label_ref, logits_ref, loss_ref,
                       xs_ref, m_ref, l_ref, t_ref,
                       *, cos_m, sin_m, th, mm, s, easy_margin,
                       c_valid, c_pad, class_tile):
    j = pl.program_id(1)
    n_class_tiles = pl.num_programs(1)

    # ---- per-batch-tile init (runs on the first class tile) ----
    @pl.when(j == 0)
    def _init():
        x = x_ref[...].astype(jnp.float32)
        # F.normalize(x, dim=1): x * rsqrt(max(||x||^2, eps^2))
        inv = jax.lax.rsqrt(jnp.maximum(jnp.sum(x * x, axis=1, keepdims=True), 1e-24))
        xs_ref[...] = (x * inv).astype(xs_ref.dtype)          # bf16 MXU operand
        m_ref[...] = jnp.full_like(m_ref, -jnp.inf)
        l_ref[...] = jnp.zeros_like(l_ref)
        t_ref[...] = jnp.zeros_like(t_ref)

    # ---- normalize this weight tile, feed MXU in bf16 (f32 accumulate) ----
    w = w_ref[...].astype(jnp.float32)                        # [tC, D]
    w_inv = jax.lax.rsqrt(jnp.maximum(jnp.sum(w * w, axis=1, keepdims=True), 1e-24))
    w_n = (w * w_inv).astype(jnp.bfloat16)

    cosine = jax.lax.dot_general(
        xs_ref[...], w_n,
        dimension_numbers=(((1,), (1,)), ((), ())),
        preferred_element_type=jnp.float32)                   # [tB, tC] f32

    tB, tC = cosine.shape
    label = label_ref[...]                                    # [tB, 1] int32
    cls = jax.lax.broadcasted_iota(jnp.int32, (tB, tC), 1) + j * class_tile
    one_hot = (cls == label).astype(jnp.float32)              # [tB, tC]

    # ---- margin math restricted to the target column ([tB,1], not [tB,tC]) ----
    cos_t = jnp.sum(one_hot * cosine, axis=1, keepdims=True)  # target cosine (0 if not in tile)
    hit = jnp.sum(one_hot, axis=1, keepdims=True)             # 1 iff target class in this tile
    sin_t = jnp.sqrt(jnp.clip(1.0 - cos_t * cos_t, 0.0, 1.0))
    phi_t = cos_t * cos_m - sin_t * sin_m
    if easy_margin:
        phi_t = jnp.where(cos_t > 0, phi_t, cos_t)
    else:
        phi_t = jnp.where(cos_t - th > 0, phi_t, cos_t - mm)

    # output = s * (one_hot * phi + (1 - one_hot) * cosine)
    out_tile = s * (cosine + one_hot * (phi_t - cos_t))       # [tB, tC] scaled logits
    if c_pad != c_valid:
        out_tile = jnp.where(cls < c_valid, out_tile, _NEG_BIG)

    logits_ref[...] = out_tile.astype(logits_ref.dtype)

    # ---- online log-sum-exp + target-logit accumulation ----
    t_ref[...] = t_ref[...] + s * phi_t * hit
    tile_max = jnp.max(out_tile, axis=1, keepdims=True)
    m_new = jnp.maximum(m_ref[...], tile_max)
    l_ref[...] = l_ref[...] * jnp.exp(m_ref[...] - m_new) + jnp.sum(
        jnp.exp(out_tile - m_new), axis=1, keepdims=True)
    m_ref[...] = m_new

    @pl.when(j == n_class_tiles - 1)
    def _finalize():
        lse = m_ref[...] + jnp.log(l_ref[...])
        loss_ref[...] = (lse - t_ref[...]).astype(loss_ref.dtype)   # per-row CE loss


def _round_up(v, m):
    return ((v + m - 1) // m) * m


def aamsoftmax_forward(x, weight, label, *, m=0.2, s=30.0, easy_margin=False,
                       class_tile=None, batch_tile=None):
    """Returns (loss, prec1, prec5) matching the PyTorch AAMSoftmax.forward."""
    B, D = x.shape
    C, D2 = weight.shape
    assert D == D2, "feature dims of x and weight must match"

    # ---- tile sizes: lane-dense 128-multiple class tiles, 8-aligned batch tiles ----
    if class_tile is None:
        budget = 8 * 1024 * 1024                      # ~8 MiB per f32 weight tile (VMEM-safe on v7x)
        class_tile = max(128, min(1024, (budget // max(D * 4, 1)) // 128 * 128))
    class_tile = min(class_tile, _round_up(C, 128))
    C_pad = _round_up(C, class_tile)

    if batch_tile is None:
        batch_tile = min(_round_up(B, 8), 128)
    batch_tile = _round_up(batch_tile, 8)
    B_pad = _round_up(B, batch_tile)

    x_p = x if B_pad == B else jnp.zeros((B_pad, D), x.dtype).at[:B].set(x)
    w_p = weight if C_pad == C else jnp.zeros((C_pad, D), weight.dtype).at[:C].set(weight)
    label2d = jnp.full((B_pad, 1), -1, jnp.int32).at[:B, 0].set(label.astype(jnp.int32))

    n_b = B_pad // batch_tile
    n_c = C_pad // class_tile

    kernel = functools.partial(
        _aamsoftmax_kernel,
        cos_m=math.cos(m), sin_m=math.sin(m),
        th=math.cos(math.pi - m), mm=math.sin(math.pi - m) * m,
        s=float(s), easy_margin=bool(easy_margin),
        c_valid=C, c_pad=C_pad, class_tile=class_tile)

    logits_pad, per_row_loss = pl.pallas_call(
        kernel,
        out_shape=(jax.ShapeDtypeStruct((B_pad, C_pad), jnp.bfloat16),
                   jax.ShapeDtypeStruct((B_pad, 1), jnp.float32)),
        grid=(n_b, n_c),
        in_specs=[pl.BlockSpec((batch_tile, D), lambda i, j: (i, 0)),
                  pl.BlockSpec((class_tile, D), lambda i, j: (j, 0)),
                  pl.BlockSpec((batch_tile, 1), lambda i, j: (i, 0))],
        out_specs=(pl.BlockSpec((batch_tile, class_tile), lambda i, j: (i, j)),
                   pl.BlockSpec((batch_tile, 1), lambda i, j: (i, 0))),
        scratch_shapes=[pltpu.VMEM((batch_tile, D), jnp.bfloat16),   # normalized x (bf16)
                        pltpu.VMEM((batch_tile, 1), jnp.float32),    # running max
                        pltpu.VMEM((batch_tile, 1), jnp.float32),    # running sum-exp
                        pltpu.VMEM((batch_tile, 1), jnp.float32)],   # target logit
        compiler_params=pltpu.CompilerParams(
            dimension_semantics=("parallel", "arbitrary")),
    )(x_p, w_p, label2d)

    # Mean-reduced cross entropy over the valid batch rows.
    loss = jnp.sum(per_row_loss[:B, 0]) / B

    # --- accuracy(output, label, topk=(1, 5)) — glue in plain JAX ---
    logits = logits_pad[:B, :C].astype(jnp.float32)
    k = min(5, C)
    _, topk_idx = jax.lax.top_k(logits, k)                     # [B, k]
    correct = (topk_idx == label.reshape(B, 1)).astype(jnp.float32)
    prec1 = 100.0 * jnp.sum(correct[:, :1]) / B
    prec5 = 100.0 * jnp.sum(correct[:, :k]) / B
    return loss, prec1, prec5


if __name__ == "__main__":
    key = jax.random.PRNGKey(0)
    B, in_feats, n_classes = 8, 32, 10

    kx, kw, kl = jax.random.split(key, 3)
    x = jax.random.normal(kx, (B, in_feats), dtype=jnp.float32)

    # Deterministic xavier_normal_ init: std = gain * sqrt(2 / (fan_in + fan_out))
    std = 1.0 * math.sqrt(2.0 / (n_classes + in_feats))
    weight = std * jax.random.normal(kw, (n_classes, in_feats), dtype=jnp.float32)

    label = jax.random.randint(kl, (B,), 0, n_classes, dtype=jnp.int32)

    loss, prec1, prec5 = aamsoftmax_forward(x, weight, label, m=0.2, s=30.0,
                                            easy_margin=False)
    jax.block_until_ready((loss, prec1, prec5))
    print("KERNEL_OK")
</pallas_src>

<mosaic_0001>
module attributes {stable_mosaic.version = 11 : i64} {
  func.func @_aamsoftmax_kernel(%arg0: i32, %arg1: i32, %arg2: memref<8x32xf32, #tpu.memory_space<vmem>>, %arg3: memref<128x32xf32, #tpu.memory_space<vmem>>, %arg4: memref<8x1xi32, #tpu.memory_space<vmem>>, %arg5: memref<8x128xbf16, #tpu.memory_space<vmem>>, %arg6: memref<8x1xf32, #tpu.memory_space<vmem>>, %arg7: memref<8x32xbf16, #tpu.memory_space<vmem>>, %arg8: memref<8x1xf32, #tpu.memory_space<vmem>>, %arg9: memref<8x1xf32, #tpu.memory_space<vmem>>, %arg10: memref<8x1xf32, #tpu.memory_space<vmem>>) attributes {dimension_semantics = [#tpu.dimension_semantics<parallel>, #tpu.dimension_semantics<arbitrary>], iteration_bounds = array<i64: 1, 1>, scalar_prefetch = 0 : i64, scratch_operands = 4 : i64, tpu.core_type = #tpu.core_type<tc>, window_params = [{transform_indices = @transform_0, window_bounds = array<i64: 8, 32>}, {transform_indices = @transform_1, window_bounds = array<i64: 128, 32>}, {transform_indices = @transform_2, window_bounds = array<i64: 8, 1>}, {transform_indices = @transform_3, window_bounds = array<i64: 8, 128>}, {transform_indices = @transform_4, window_bounds = array<i64: 8, 1>}]} {
    %c0_i32 = arith.constant 0 : i32
    %0 = arith.cmpi eq, %arg1, %c0_i32 : i32
    %1 = arith.extui %0 : i1 to i32
    %c0_i32_0 = arith.constant 0 : i32
    %2 = arith.cmpi ne, %1, %c0_i32_0 : i32
    scf.if %2 {
      %c0_41 = arith.constant 0 : index
      %c0_42 = arith.constant 0 : index
      %87 = vector.load %arg2[%c0_41, %c0_42] : memref<8x32xf32, #tpu.memory_space<vmem>>, vector<8x32xf32>
      %88 = arith.mulf %87, %87 : vector<8x32xf32>
      %cst_43 = arith.constant dense<0.000000e+00> : vector<8xf32>
      %89 = vector.multi_reduction <add>, %88, %cst_43 [1] : vector<8x32xf32> to vector<8xf32>
      %90 = vector.shape_cast %89 : vector<8xf32> to vector<8x1xf32>
      %cst_44 = arith.constant 1.000000e-24 : f32
      %91 = vector.broadcast %cst_44 : f32 to vector<8x1xf32>
      %92 = arith.maximumf %90, %91 : vector<8x1xf32>
      %93 = math.rsqrt %92 : vector<8x1xf32>
      %94 = vector.broadcast %93 : vector<8x1xf32> to vector<8x32xf32>
      %95 = arith.mulf %87, %94 : vector<8x32xf32>
      %96 = arith.truncf %95 : vector<8x32xf32> to vector<8x32xbf16>
      %c0_45 = arith.constant 0 : index
      %c0_46 = arith.constant 0 : index
      %97 = vector.load %arg7[%c0_45, %c0_46] : memref<8x32xbf16, #tpu.memory_space<vmem>>, vector<8x32xbf16>
      tpu.vector_store %arg7[%c0_45, %c0_46], %96 {strides = array<i32>} : memref<8x32xbf16, #tpu.memory_space<vmem>>, vector<8x32xbf16>,
      %cst_47 = arith.constant 0xFF800000 : f32
      %98 = vector.broadcast %cst_47 : f32 to vector<8x1xf32>
      %c0_48 = arith.constant 0 : index
      %c0_49 = arith.constant 0 : index
      %99 = vector.load %arg8[%c0_48, %c0_49] : memref<8x1xf32, #tpu.memory_space<vmem>>, vector<8x1xf32>
      tpu.vector_store %arg8[%c0_48, %c0_49], %98 {strides = array<i32>} : memref<8x1xf32, #tpu.memory_space<vmem>>, vector<8x1xf32>,
      %cst_50 = arith.constant 0.000000e+00 : f32
      %100 = vector.broadcast %cst_50 : f32 to vector<8x1xf32>
      %c0_51 = arith.constant 0 : index
      %c0_52 = arith.constant 0 : index
      %101 = vector.load %arg9[%c0_51, %c0_52] : memref<8x1xf32, #tpu.memory_space<vmem>>, vector<8x1xf32>
      tpu.vector_store %arg9[%c0_51, %c0_52], %100 {strides = array<i32>} : memref<8x1xf32, #tpu.memory_space<vmem>>, vector<8x1xf32>,
      %cst_53 = arith.constant 0.000000e+00 : f32
      %102 = vector.broadcast %cst_53 : f32 to vector<8x1xf32>
      %c0_54 = arith.constant 0 : index
      %c0_55 = arith.constant 0 : index
      %103 = vector.load %arg10[%c0_54, %c0_55] : memref<8x1xf32, #tpu.memory_space<vmem>>, vector<8x1xf32>
      tpu.vector_store %arg10[%c0_54, %c0_55], %102 {strides = array<i32>} : memref<8x1xf32, #tpu.memory_space<vmem>>, vector<8x1xf32>,
    } else {
    }
    %c0 = arith.constant 0 : index
    %c0_1 = arith.constant 0 : index
    %3 = vector.load %arg3[%c0, %c0_1] : memref<128x32xf32, #tpu.memory_space<vmem>>, vector<128x32xf32>
    %4 = arith.mulf %3, %3 : vector<128x32xf32>
    %cst = arith.constant dense<0.000000e+00> : vector<128xf32>
    %5 = vector.multi_reduction <add>, %4, %cst [1] : vector<128x32xf32> to vector<128xf32>
    %6 = vector.shape_cast %5 : vector<128xf32> to vector<128x1xf32>
    %cst_2 = arith.constant 1.000000e-24 : f32
    %7 = vector.broadcast %cst_2 : f32 to vector<128x1xf32>
    %8 = arith.maximumf %6, %7 : vector<128x1xf32>
    %9 = math.rsqrt %8 : vector<128x1xf32>
    %10 = vector.broadcast %9 : vector<128x1xf32> to vector<128x32xf32>
    %11 = arith.mulf %3, %10 : vector<128x32xf32>
    %12 = arith.truncf %11 : vector<128x32xf32> to vector<128x32xbf16>
    %c0_3 = arith.constant 0 : index
    %c0_4 = arith.constant 0 : index
    %13 = vector.load %arg7[%c0_3, %c0_4] : memref<8x32xbf16, #tpu.memory_space<vmem>>, vector<8x32xbf16>
    %cst_5 = arith.constant dense<0.000000e+00> : vector<8x128xf32>
    %14 = tpu.matmul %13, %12, %cst_5 {dimension_numbers = #tpu.dot_dimension_numbers<[1], [1], [0], [0], [0, 0, 1, 0], [], []>} : vector<8x32xbf16>, vector<128x32xbf16>, vector<8x128xf32> -> vector<8x128xf32>
    %c0_6 = arith.constant 0 : index
    %c0_7 = arith.constant 0 : index
    %15 = vector.load %arg4[%c0_6, %c0_7] : memref<8x1xi32, #tpu.memory_space<vmem>>, vector<8x1xi32>
    %16 = tpu.iota {dimensions = array<i32: 1>} : vector<8x128xi32>
    %c128_i32 = arith.constant 128 : i32
    %17 = arith.muli %arg1, %c128_i32 : i32
    %18 = vector.broadcast %17 : i32 to vector<8x128xi32>
    %19 = arith.addi %16, %18 : vector<8x128xi32>
    %20 = vector.broadcast %15 : vector<8x1xi32> to vector<8x128xi32>
    %21 = arith.cmpi eq, %19, %20 : vector<8x128xi32>
    %22 = arith.extui %21 : vector<8x128xi1> to vector<8x128xi32>
    %23 = arith.sitofp %22 : vector<8x128xi32> to vector<8x128xf32>
    %24 = arith.mulf %23, %14 : vector<8x128xf32>
    %cst_8 = arith.constant dense<0.000000e+00> : vector<8xf32>
    %25 = vector.multi_reduction <add>, %24, %cst_8 [1] : vector<8x128xf32> to vector<8xf32>
    %26 = vector.shape_cast %25 : vector<8xf32> to vector<8x1xf32>
    %cst_9 = arith.constant dense<0.000000e+00> : vector<8xf32>
    %27 = vector.multi_reduction <add>, %23, %cst_9 [1] : vector<8x128xf32> to vector<8xf32>
    %28 = vector.shape_cast %27 : vector<8xf32> to vector<8x1xf32>
    %29 = arith.mulf %26, %26 : vector<8x1xf32>
    %cst_10 = arith.constant 1.000000e+00 : f32
    %30 = vector.broadcast %cst_10 : f32 to vector<8x1xf32>
    %31 = arith.subf %30, %29 : vector<8x1xf32>
    %cst_11 = arith.constant 0.000000e+00 : f32
    %cst_12 = arith.constant 1.000000e+00 : f32
    %32 = vector.broadcast %cst_11 : f32 to vector<8x1xf32>
    %33 = arith.maximumf %32, %31 : vector<8x1xf32>
    %34 = vector.broadcast %cst_12 : f32 to vector<8x1xf32>
    %35 = arith.minimumf %34, %33 : vector<8x1xf32>
    %36 = math.sqrt %35 : vector<8x1xf32>
    %cst_13 = arith.constant 0.980066597 : f32
    %37 = vector.broadcast %cst_13 : f32 to vector<8x1xf32>
    %38 = arith.mulf %26, %37 : vector<8x1xf32>
    %cst_14 = arith.constant 0.198669329 : f32
    %39 = vector.broadcast %cst_14 : f32 to vector<8x1xf32>
    %40 = arith.mulf %36, %39 : vector<8x1xf32>
    %41 = arith.subf %38, %40 : vector<8x1xf32>
    %cst_15 = arith.constant -0.980066597 : f32
    %42 = vector.broadcast %cst_15 : f32 to vector<8x1xf32>
    %43 = arith.subf %26, %42 : vector<8x1xf32>
    %cst_16 = arith.constant 0.000000e+00 : f32
    %44 = vector.broadcast %cst_16 : f32 to vector<8x1xf32>
    %45 = arith.cmpf ogt, %43, %44 : vector<8x1xf32>
    %cst_17 = arith.constant 0.0397338644 : f32
    %46 = vector.broadcast %cst_17 : f32 to vector<8x1xf32>
    %47 = arith.subf %26, %46 : vector<8x1xf32>
    %48 = arith.select %45, %41, %47 : vector<8x1xi1>, vector<8x1xf32>
    %49 = arith.subf %48, %26 : vector<8x1xf32>
    %50 = vector.broadcast %49 : vector<8x1xf32> to vector<8x128xf32>
    %51 = arith.mulf %23, %50 : vector<8x128xf32>
    %52 = arith.addf %14, %51 : vector<8x128xf32>
    %cst_18 = arith.constant 3.000000e+01 : f32
    %53 = vector.broadcast %cst_18 : f32 to vector<8x128xf32>
    %54 = arith.mulf %53, %52 : vector<8x128xf32>
    %c10_i32 = arith.constant 10 : i32
    %55 = vector.broadcast %c10_i32 : i32 to vector<8x128xi32>
    %56 = arith.cmpi slt, %19, %55 : vector<8x128xi32>
    %cst_19 = arith.constant -1.000000e+30 : f32
    %57 = vector.broadcast %cst_19 : f32 to vector<8x128xf32>
    %58 = arith.select %56, %54, %57 : vector<8x128xi1>, vector<8x128xf32>
    %59 = arith.truncf %58 : vector<8x128xf32> to vector<8x128xbf16>
    %c0_20 = arith.constant 0 : index
    %c0_21 = arith.constant 0 : index
    %60 = vector.load %arg5[%c0_20, %c0_21] : memref<8x128xbf16, #tpu.memory_space<vmem>>, vector<8x128xbf16>
    tpu.vector_store %arg5[%c0_20, %c0_21], %59 {strides = array<i32>} : memref<8x128xbf16, #tpu.memory_space<vmem>>, vector<8x128xbf16>,
    %c0_22 = arith.constant 0 : index
    %c0_23 = arith.constant 0 : index
    %61 = vector.load %arg10[%c0_22, %c0_23] : memref<8x1xf32, #tpu.memory_space<vmem>>, vector<8x1xf32>
    %cst_24 = arith.constant 3.000000e+01 : f32
    %62 = vector.broadcast %cst_24 : f32 to vector<8x1xf32>
    %63 = arith.mulf %62, %48 : vector<8x1xf32>
    %64 = arith.mulf %63, %28 : vector<8x1xf32>
    %65 = arith.addf %61, %64 : vector<8x1xf32>
    %c0_25 = arith.constant 0 : index
    %c0_26 = arith.constant 0 : index
    %66 = vector.load %arg10[%c0_25, %c0_26] : memref<8x1xf32, #tpu.memory_space<vmem>>, vector<8x1xf32>
    tpu.vector_store %arg10[%c0_25, %c0_26], %65 {strides = array<i32>} : memref<8x1xf32, #tpu.memory_space<vmem>>, vector<8x1xf32>,
    %cst_27 = arith.constant dense<0xFF800000> : vector<8xf32>
    %67 = vector.multi_reduction <maximumf>, %58, %cst_27 [1] : vector<8x128xf32> to vector<8xf32>
    %68 = vector.shape_cast %67 : vector<8xf32> to vector<8x1xf32>
    %c0_28 = arith.constant 0 : index
    %c0_29 = arith.constant 0 : index
    %69 = vector.load %arg8[%c0_28, %c0_29] : memref<8x1xf32, #tpu.memory_space<vmem>>, vector<8x1xf32>
    %70 = arith.maximumf %69, %68 : vector<8x1xf32>
    %c0_30 = arith.constant 0 : index
    %c0_31 = arith.constant 0 : index
    %71 = vector.load %arg9[%c0_30, %c0_31] : memref<8x1xf32, #tpu.memory_space<vmem>>, vector<8x1xf32>
    %c0_32 = arith.constant 0 : index
    %c0_33 = arith.constant 0 : index
    %72 = vector.load %arg8[%c0_32, %c0_33] : memref<8x1xf32, #tpu.memory_space<vmem>>, vector<8x1xf32>
    %73 = arith.subf %72, %70 : vector<8x1xf32>
    %74 = math.exp %73 : vector<8x1xf32>
    %75 = arith.mulf %71, %74 : vector<8x1xf32>
    %76 = vector.broadcast %70 : vector<8x1xf32> to vector<8x128xf32>
    %77 = arith.subf %58, %76 : vector<8x128xf32>
    %78 = math.exp %77 : vector<8x128xf32>
    %cst_34 = arith.constant dense<0.000000e+00> : vector<8xf32>
    %79 = vector.multi_reduction <add>, %78, %cst_34 [1] : vector<8x128xf32> to vector<8xf32>
    %80 = vector.shape_cast %79 : vector<8xf32> to vector<8x1xf32>
    %81 = arith.addf %75, %80 : vector<8x1xf32>
    %c0_35 = arith.constant 0 : index
    %c0_36 = arith.constant 0 : index
    %82 = vector.load %arg9[%c0_35, %c0_36] : memref<8x1xf32, #tpu.memory_space<vmem>>, vector<8x1xf32>
    tpu.vector_store %arg9[%c0_35, %c0_36], %81 {strides = array<i32>} : memref<8x1xf32, #tpu.memory_space<vmem>>, vector<8x1xf32>,
    %c0_37 = arith.constant 0 : index
    %c0_38 = arith.constant 0 : index
    %83 = vector.load %arg8[%c0_37, %c0_38] : memref<8x1xf32, #tpu.memory_space<vmem>>, vector<8x1xf32>
    tpu.vector_store %arg8[%c0_37, %c0_38], %70 {strides = array<i32>} : memref<8x1xf32, #tpu.memory_space<vmem>>, vector<8x1xf32>,
    %c0_i32_39 = arith.constant 0 : i32
    %84 = arith.cmpi eq, %arg1, %c0_i32_39 : i32
    %85 = arith.extui %84 : i1 to i32
    %c0_i32_40 = arith.constant 0 : i32
    %86 = arith.cmpi ne, %85, %c0_i32_40 : i32
    scf.if %86 {
      %c0_41 = arith.constant 0 : index
      %c0_42 = arith.constant 0 : index
      %87 = vector.load %arg8[%c0_41, %c0_42] : memref<8x1xf32, #tpu.memory_space<vmem>>, vector<8x1xf32>
      %c0_43 = arith.constant 0 : index
      %c0_44 = arith.constant 0 : index
      %88 = vector.load %arg9[%c0_43, %c0_44] : memref<8x1xf32, #tpu.memory_space<vmem>>, vector<8x1xf32>
      %89 = math.log %88 : vector<8x1xf32>
      %90 = arith.addf %87, %89 : vector<8x1xf32>
      %c0_45 = arith.constant 0 : index
      %c0_46 = arith.constant 0 : index
      %91 = vector.load %arg10[%c0_45, %c0_46] : memref<8x1xf32, #tpu.memory_space<vmem>>, vector<8x1xf32>
      %92 = arith.subf %90, %91 : vector<8x1xf32>
      %c0_47 = arith.constant 0 : index
      %c0_48 = arith.constant 0 : index
      %93 = vector.load %arg6[%c0_47, %c0_48] : memref<8x1xf32, #tpu.memory_space<vmem>>, vector<8x1xf32>
      tpu.vector_store %arg6[%c0_47, %c0_48], %92 {strides = array<i32>} : memref<8x1xf32, #tpu.memory_space<vmem>>, vector<8x1xf32>,
    } else {
    }
    return
  }
  func.func @transform_0(%arg0: i32, %arg1: i32) -> (i32, i32) {
    %c0_i32 = arith.constant 0 : i32
    %c0_i32_0 = arith.constant 0 : i32
    return %arg0, %c0_i32 : i32, i32
  }
  func.func @transform_1(%arg0: i32, %arg1: i32) -> (i32, i32) {
    %c0_i32 = arith.constant 0 : i32
    %c0_i32_0 = arith.constant 0 : i32
    return %arg1, %c0_i32 : i32, i32
  }
  func.func @transform_2(%arg0: i32, %arg1: i32) -> (i32, i32) {
    %c0_i32 = arith.constant 0 : i32
    %c0_i32_0 = arith.constant 0 : i32
    return %arg0, %c0_i32 : i32, i32
  }
  func.func @transform_3(%arg0: i32, %arg1: i32) -> (i32, i32) {
    %c0_i32 = arith.constant 0 : i32
    return %arg0, %arg1 : i32, i32
  }
  func.func @transform_4(%arg0: i32, %arg1: i32) -> (i32, i32) {
    %c0_i32 = arith.constant 0 : i32
    %c0_i32_0 = arith.constant 0 : i32
    return %arg0, %c0_i32 : i32, i32
  }
}

</mosaic_0001>

<bundles_post_ra>
// kernel: tpu_custom_call.1
= control target key start
LH: loop header
LB: loop body
LE: loop exit
PB: predicated region body
PF: predicated region fallthrough
CT: control target
= control target key end

     0   :  { %vm24_vm0 = vcmask 261120   ;;  %s678_s0 = inlined_call_operand.vmem [shape: f32[8,32], index: 0, kind: input, shape index: {}]   ;;  %s679_s1 = inlined_call_operand.vmem [shape: f32[128,32], index: 1, kind: input, shape index: {}]   ;;  %s680_s2 = inlined_call_operand.vmem [shape: s32[8,1], index: 2, kind: input, shape index: {}]   ;;  %s681_s3 = inlined_call_operand.hbm [shape: bf16[8,128], index: 3, kind: output, shape index: {0}]   ;;  %s682_s4 = inlined_call_operand.vmem [shape: f32[8,1], index: 4, kind: output, shape index: {1}]  }
   0x1   :  { %v482_v0 = vld [vmem:[%s679_s1] sm:$0xff]  ;;  %v487_v1 = vld [vmem:[%s679_s1 + $0x10] sm:$0xff]  ;;  %v492_v2 = vld [vmem:[%s679_s1 + $0x8] sm:$0xff] }
   0x2   :  { %v54_v3 = vmul.f32 %v482_v0, %v482_v0  ;;  %v56_v4 = vmul.f32 %v487_v1, %v487_v1  ;;  %v55_v5 = vmul.f32 %v492_v2, %v492_v2  ;;  %v503_v6 = vld [vmem:[%s679_s1 + $0x18] sm:$0xff]  ;;  %v510_v8 = vld [vmem:[%s679_s1 + $0x28] sm:$0xff]  ;;  %v515_v9 = vld [vmem:[%s679_s1 + $0x20] sm:$0xff] }
   0x3   :  { %v57_v7 = vmul.f32 %v503_v6, %v503_v6  ;;  %v59_v14 = vmul.f32 %v510_v8, %v510_v8  ;;  %v58_v15 = vmul.f32 %v515_v9, %v515_v9 }
   0x4   :  { %v71_v10 = vsel %vm24_vm0, %v54_v3, 0.0  ;;  %v77_v11 = vsel %vm24_vm0, %v56_v4, 0.0  ;;  %v74_v12 = vsel %vm24_vm0, %v55_v5, 0.0 }
   0x5   :  { %72 = vadd.xlane.f32.xlu0 %v71_v10  ;;  %78 = vadd.xlane.f32.xlu1 %v77_v11  ;;  %v80_v13 = vsel %vm24_vm0, %v57_v7, 0.0 }
   0x6   :  { %10 = vsyncpa [#allocation7], 0  ;;  %v528_v16 = vld [vmem:[%s679_s1 + $0x38] sm:$0xff]  ;;  %v533_v17 = vld [vmem:[%s679_s1 + $0x30] sm:$0xff]  ;;  %v86_v18 = vsel %vm24_vm0, %v59_v14, 0.0  ;;  %v83_v19 = vsel %vm24_vm0, %v58_v15, 0.0 }
   0x7   :  { %v61_v20 = vmul.f32 %v528_v16, %v528_v16  ;;  %v60_v21 = vmul.f32 %v533_v17, %v533_v17  ;;  %v544_v22 = vld [vmem:[%s679_s1 + $0x48] sm:$0xff]  ;;  %v549_v23 = vld [vmem:[%s679_s1 + $0x40] sm:$0xff]  ;;  %v560_v28 = vld [vmem:[%s679_s1 + $0x58] sm:$0xff]  ;;  %v449_v50 = vmov 0.0   ;;  %vm450_vm1 = vmmov 0  }
   0x8   :  { %v63_v26 = vmul.f32 %v544_v22, %v544_v22  ;;  %v62_v27 = vmul.f32 %v549_v23, %v549_v23  ;;  %v565_v29 = vld [vmem:[%s679_s1 + $0x50] sm:$0xff]  ;;  %v65_v32 = vmul.f32 %v560_v28, %v560_v28  ;;  %v576_v34 = vld [vmem:[%s679_s1 + $0x68] sm:$0xff]  ;;  %v581_v35 = vld [vmem:[%s679_s1 + $0x60] sm:$0xff]  ;;  %356 = vmatprep.subr.bf16.mxu0 %v449_v50  ;;  %372 = vmatprep.mubr.msk.bf16.mxu0 %vm450_vm1, %v449_v50  ;;  %v451_v53 = vmov 0  }
   0x9   :  { %75 = vadd.xlane.f32.xlu0 %v74_v12  ;;  %81 = vadd.xlane.f32.xlu1 %v80_v13  ;;  %v92_v24 = vsel %vm24_vm0, %v61_v20, 0.0  ;;  %v89_v25 = vsel %vm24_vm0, %v60_v21, 0.0  ;;  %v64_v33 = vmul.f32 %v565_v29, %v565_v29  ;;  %v67_v38 = vmul.f32 %v576_v34, %v576_v34  ;;  %v592_v40 = vld [vmem:[%s678_s0] sm:$0xff]  ;;  %v597_v41 = vld [vmem:[%s679_s1 + $0x70] sm:$0xff]  ;;  %v608_v46 = vld [vmem:[%s679_s1 + $0x78] sm:$0xff] }
   0xa   :  { %v98_v30 = vsel %vm24_vm0, %v63_v26, 0.0  ;;  %v95_v31 = vsel %vm24_vm0, %v62_v27, 0.0  ;;  %v104_v36 = vsel %vm24_vm0, %v65_v32, 0.0  ;;  %v66_v39 = vmul.f32 %v581_v35, %v581_v35  ;;  %v243_v52 = vld [vmem:[%s680_s2] sm:$0xff]  ;;  %381 = vset.pattern.permute.xlu1 %v451_v53  ;;  %382 = vset.pattern.permute.xlu0 %v451_v53  ;;  %s453_s2 = smov [#allocation6]  }
   0xb   :  { %v101_v37 = vsel %vm24_vm0, %v64_v33, 0.0  ;;  %v110_v42 = vsel %vm24_vm0, %v67_v38, 0.0  ;;  %v23_v44 = vmul.f32 %v592_v40, %v592_v40  ;;  %v68_v45 = vmul.f32 %v597_v41, %v597_v41  ;;  %s331_s23 = sshll.u32 %s453_s2, 4  ;;  %s332_s23 = int_to_ptr.vmem [resolvable:$true] %s331_s23 }
   0xc   :  { %v107_v43 = vsel %vm24_vm0, %v66_v39, 0.0  ;;  %v69_v49 = vmul.f32 %v608_v46, %v608_v46  ;;  %vm32_vm2 = vcmask 257024   ;;  %vm34_vm4 = vcmask 7168   ;;  %s425_s24 = scalar_lea.vmem %s332_s23, 64  ;;  %p430_p1 = scmp.lt.s32.totalorder %s332_s23, %s332_s23 }
   0xd   :  { %87 = vadd.xlane.f32.xlu1 %v86_v18  ;;  %84 = vadd.xlane.f32.xlu0 %v83_v19  ;;  %v25_v47 = vsel %vm24_vm0, %v23_v44, 0.0  ;;  %v113_v48 = vsel %vm24_vm0, %v68_v45, 0.0  ;;  %36 = vst.msk [vmem:[#allocation4] sm:$0xff] %vm34_vm4, %v449_v50  ;;  %37 = vst.msk [vmem:[#allocation5] sm:$0xff] %vm34_vm4, %v449_v50  ;;  %p426_p0 = scmp.ne.s32.totalorder %s332_s23, %s425_s24  ;;  %p431_p2 = scmp.lt.s32.totalorder %s425_s24, %s425_s24 }
   0xe   :  { %v116_v51 = vsel %vm24_vm0, %v69_v49, 0.0 }
   0xf   :  { %p432_p3 = por %p431_p2, %p430_p1 }
  0x11   :  { %93 = vadd.xlane.f32.xlu1 %v92_v24  ;;  %90 = vadd.xlane.f32.xlu0 %v89_v25  ;;  %p433_p4 = pnand %p432_p3, %p426_p0 }
  0x15   :  { %99 = vadd.xlane.f32.xlu1 %v98_v30  ;;  %96 = vadd.xlane.f32.xlu0 %v95_v31 }
  0x19   :  { %105 = vadd.xlane.f32.xlu1 %v104_v36  ;;  %102 = vadd.xlane.f32.xlu0 %v101_v37 }
  0x1d   :  { %111 = vadd.xlane.f32.xlu1 %v110_v42  ;;  %108 = vadd.xlane.f32.xlu0 %v107_v43 }
  0x21   :  { %26 = vadd.xlane.f32.xlu0 %v25_v47  ;;  %114 = vadd.xlane.f32.xlu1 %v113_v48 }
  0x25   :  { %117 = vadd.xlane.f32.xlu0 %v116_v51 }
  0x32   :  { %250 = vperm.xlu1 %381, %v243_v52  }
  0x92   :  { %v73_v54 = vpop.xlane.xlu0 %72  ;;  %v79_v55 = vpop.xlane.xlu1 %78 }
  0x93   :  { %v119_v56 = vmax.f32 %v73_v54, 1e-24  ;;  %v121_v57 = vmax.f32 %v79_v55, 1e-24 }
  0x95   :  { %383 = vrsqrt.f32 %v119_v56 }
  0x96   :  { %v76_v58 = vpop.xlane.xlu0 %75  ;;  %v82_v59 = vpop.xlane.xlu1 %81 }
  0x97   :  { %v120_v60 = vmax.f32 %v76_v58, 1e-24  ;;  %v122_v61 = vmax.f32 %v82_v59, 1e-24 }
  0x99   :  { %385 = vrsqrt.f32 %v120_v60 }
  0x9a   :  { %387 = vrsqrt.f32 %v121_v57  ;;  %v88_v62 = vpop.xlane.xlu1 %87  ;;  %v85_v63 = vpop.xlane.xlu0 %84 }
  0x9b   :  { %389 = vrsqrt.f32 %v122_v61  ;;  %v124_v3 = vmax.f32 %v88_v62, 1e-24  ;;  %v123_v4 = vmax.f32 %v85_v63, 1e-24 }
  0x9d   :  { %391 = vrsqrt.f32 %v124_v3 }
  0x9e   :  { %v91_v5 = vpop.xlane.xlu0 %90  ;;  %393 = vrsqrt.f32 %v123_v4  ;;  %v94_v10 = vpop.xlane.xlu1 %93 }
  0x9f   :  { %v384_v7 = vpop.eup %383  ;;  %v126_v18 = vmax.f32 %v94_v10, 1e-24  ;;  %v125_v20 = vmax.f32 %v91_v5, 1e-24 }
  0xa0   :  { %v151_v14 = vmul.f32 %v384_v7, %v482_v0 }
  0xa1   :  { %395 = vrsqrt.f32 %v126_v18 }
  0xa2   :  { %v97_v11 = vpop.xlane.xlu0 %96  ;;  %v100_v30 = vpop.xlane.xlu1 %99  ;;  %397 = vrsqrt.f32 %v125_v20 }
  0xa3   :  { %v386_v12 = vpop.eup %385  ;;  %v128_v32 = vmax.f32 %v100_v30, 1e-24  ;;  %v127_v36 = vmax.f32 %v97_v11, 1e-24 }
  0xa4   :  { %v388_v13 = vpop.eup %387  ;;  %v152_v15 = vmul.f32 %v386_v12, %v492_v2 }
  0xa5   :  { %v390_v19 = vpop.eup %389  ;;  %v153_v26 = vmul.f32 %v388_v13, %v487_v1  ;;  %399 = vrsqrt.f32 %v128_v32  ;;  %v452_v32 = vmov -inf  }
  0xa6   :  { %v167_v21 = vpack.c.bf16 %v152_v15, %v151_v14  ;;  %v103_v24 = vpop.xlane.xlu0 %102  ;;  %v154_v27 = vmul.f32 %v390_v19, %v503_v6  ;;  %401 = vrsqrt.f32 %v127_v36  ;;  %v106_v42 = vpop.xlane.xlu1 %105  ;;  %35 = vst.msk [vmem:[#allocation3] sm:$0xff] %vm34_vm4, %v452_v32 }
  0xa7   :  { %v392_v31 = vpop.eup %391  ;;  %v130_v47 = vmax.f32 %v106_v42, 1e-24  ;;  %v129_v48 = vmax.f32 %v103_v24, 1e-24 }
  0xa8   :  { %v180_v25 = vsel %vm24_vm0, %v167_v21, 0  ;;  %v394_v2 = vpop.eup %393  ;;  %v168_v33 = vpack.c.bf16 %v154_v27, %v153_v26  ;;  %v156_v38 = vmul.f32 %v392_v31, %v510_v8 }
  0xa9   :  { %357 = vmatpush3.bf16.xpose.msra.mxu0 %v180_v25  ;;  %v155_v37 = vmul.f32 %v394_v2, %v515_v9  ;;  %v244_v25 = vlaneseq }
  0xaa   :  { %358 = vmatprep.subr.bf16.mxu0 %v449_v50  ;;  %v109_v0 = vpop.xlane.xlu0 %108  ;;  %v183_v6 = vsel %vm24_vm0, %v168_v33, 0  ;;  %v112_v52 = vpop.xlane.xlu1 %111 }
  0xab   :  { %v396_v43 = vpop.eup %395  ;;  %v169_v44 = vpack.c.bf16 %v156_v38, %v155_v37  ;;  %v132_v56 = vmax.f32 %v112_v52, 1e-24  ;;  %v131_v58 = vmax.f32 %v109_v0, 1e-24  ;;  %v245_v26 = vand.u32 127, %v244_v25 }
  0xac   :  { %v398_v45 = vpop.eup %397  ;;  %v158_v49 = vmul.f32 %v396_v43, %v528_v16 }
  0xad   :  { %v186_v9 = vsel %vm24_vm0, %v169_v44, 0  ;;  %v157_v8 = vmul.f32 %v398_v45, %v533_v17  ;;  %vm282_vm8 = vcmp.lt.s32.totalorder %v245_v26, 10 }
  0xae   :  { %v27_v39 = vpop.xlane.xlu0 %26  ;;  %v115_v61 = vpop.xlane.xlu1 %114 }
  0xaf   :  { %v28_v1 = vmax.f32 %v27_v39, 1e-24  ;;  %v400_v51 = vpop.eup %399  ;;  %v170_v54 = vpack.c.bf16 %v158_v49, %v157_v8  ;;  %v133_v4 = vmax.f32 %v115_v61, 1e-24 }
  0xb0   :  { %v402_v53 = vpop.eup %401  ;;  %v160_v16 = vmul.f32 %v400_v51, %v544_v22 }
  0xb1   :  { %359 = vmatpush3.bf16.xpose.msra.mxu0 %v183_v6  ;;  %403 = vrsqrt.f32 %v28_v1  ;;  %v189_v59 = vsel %vm24_vm0, %v170_v54, 0  ;;  %v159_v17 = vmul.f32 %v402_v53, %v549_v23 }
  0xb2   :  { %360 = vmatprep.subr.bf16.mxu0 %v449_v50  ;;  %405 = vrsqrt.f32 %v130_v47  ;;  %v118_v3 = vpop.xlane.xlu0 %117  ;;  %v251_v27 = vpop.permute.xlu1 %250 }
  0xb3   :  { %407 = vrsqrt.f32 %v129_v48  ;;  %v171_v63 = vpack.c.bf16 %v160_v16, %v159_v17  ;;  %v134_v5 = vmax.f32 %v118_v3, 1e-24  ;;  %vm252_vm3 = vcmp.eq.s32.totalorder %v245_v26, %v251_v27 }
  0xb4   :  { %409 = vrsqrt.f32 %v132_v56  ;;  %v344_v30 = vsel %vm252_vm3, 1.0, %v449_v50  ;;  %v294_v56 = vld [vmem:[#allocation3] sm:$0xff] }
  0xb5   :  { %411 = vrsqrt.f32 %v131_v58  ;;  %v192_v7 = vsel %vm24_vm0, %v171_v63, 0 }
  0xb6   :  { %413 = vrsqrt.f32 %v133_v4 }
  0xb7   :  { %415 = vrsqrt.f32 %v134_v5 }
  0xb9   :  { %361 = vmatpush3.bf16.xpose.msra.mxu0 %v186_v9 }
  0xba   :  { %362 = vmatprep.subr.bf16.mxu0 %v449_v50 }
  0xbb   :  { %v404_v55 = vpop.eup %403 }
  0xbc   :  { %v30_v57 = vmul.f32 %v404_v55, %v592_v40  ;;  %v406_v62 = vpop.eup %405 }
  0xbd   :  { %v408_v40 = vpop.eup %407  ;;  %v162_v22 = vmul.f32 %v406_v62, %v560_v28 }
  0xbe   :  { %v31_v60 = vpack.c.bf16 %v30_v57, %v30_v57  ;;  %v161_v23 = vmul.f32 %v408_v40, %v565_v29  ;;  %v410_v10 = vpop.eup %409 }
  0xbf   :  { %v412_v12 = vpop.eup %411  ;;  %v164_v15 = vmul.f32 %v410_v10, %v576_v34 }
  0xc0   :  { %33 = vst.msk [vmem:[#allocation2] sm:$0xf] %vm32_vm2, %v31_v60  ;;  %v172_v11 = vpack.c.bf16 %v162_v22, %v161_v23  ;;  %v163_v14 = vmul.f32 %v412_v12, %v581_v35  ;;  %v414_v18 = vpop.eup %413 }
  0xc1   :  { %363 = vmatpush3.bf16.xpose.msra.mxu0 %v189_v59  ;;  %v416_v28 = vpop.eup %415  ;;  %v165_v20 = vmul.f32 %v414_v18, %v597_v41 }
  0xc2   :  { %364 = vmatprep.subr.bf16.mxu0 %v449_v50  ;;  %v195_v13 = vsel %vm24_vm0, %v172_v11, 0  ;;  %v173_v29 = vpack.c.bf16 %v164_v15, %v163_v14  ;;  %v166_v21 = vmul.f32 %v416_v28, %v608_v46 }
  0xc4   :  { %v198_v19 = vsel %vm24_vm0, %v173_v29, 0  ;;  %v174_v24 = vpack.c.bf16 %v166_v21, %v165_v20 }
  0xc6   :  { %v201_v35 = vsel %vm24_vm0, %v174_v24, 0 }
  0xc7   :  { %v175_v34 = vld [vmem:[#allocation2] sm:$0xf] }
  0xc9   :  { %365 = vmatpush3.bf16.xpose.msra.mxu0 %v192_v7 }
  0xca   :  { %366 = vmatprep.subr.bf16.mxu0 %v449_v50 }
  0xd1   :  { %367 = vmatpush3.bf16.xpose.msra.mxu0 %v195_v13 }
  0xd2   :  { %368 = vmatprep.subr.bf16.mxu0 %v449_v50 }
  0xd9   :  { %369 = vmatpush3.bf16.xpose.msra.mxu0 %v198_v19 }
  0xda   :  { %370 = vmatprep.subr.bf16.mxu0 %v449_v50 }
  0xe1   :  { %371 = vmatpush3.bf16.xpose.msra.mxu0 %v201_v35 }
  0xe8   :  { %373 = vmatmul.mubr.msk.bf16.vlgmr.msra.gmra.mrb[0].mxu0 %vm24_vm0, %v175_v34 }
 0x1bb   :  { %v237_v31 = vpop.f32.mrb[0].mxu0 }
 0x1bc   :  { %v374_v41 = vpop.f32.mrb[1].mxu0  ;;  %v255_v0 = vmul.f32 %v344_v30, %v237_v31 }
 0x1bd   :  { %v240_v46 = vpop.f32.mrb[2].mxu0 }
 0x1be   :  { %256 = vadd.xlane.f32.xlu0 %v255_v0  ;;  %v375_v2 = vpop.f32.mrb[3].mxu0 }
 0x24b   :  { %v257_v33 = vpop.xlane.xlu0 %256 }
 0x24c   :  { %v260_v36 = vmul.f32 %v257_v33, %v257_v33  ;;  %v345_v45 = vadd.f32 0.9800666, %v257_v33  ;;  %v271_v47 = vmul.f32 0.9800666, %v257_v33  ;;  %v346_v8 = vadd.f32 -0.039733864, %v257_v33 }
 0x24e   :  { %v261_v37 = vsub.f32 1.0, %v260_v36  ;;  %vm275_vm7 = vcmp.gt.f32.partialorder %v345_v45, 0.0 }
 0x250   :  { %v262_v38 = vmax.f32 %v261_v37, 0.0 }
 0x252   :  { %v263_v39 = vmin.f32 %v262_v38, 1.0 }
 0x254   :  { %417 = vrsqrt.f32 %v263_v39  ;;  %vm266_vm5 = vcmp.eq.f32.partialorder %v263_v39, inf  ;;  %v269_v42 = vand.u32 2147483648, %v263_v39  ;;  %vm268_vm6 = vcmp.eq.f32.partialorder %v263_v39, 0.0 }
 0x25e   :  { %v418_v1 = vpop.eup %417 }
 0x25f   :  { %v265_v6 = vmul.f32 %v418_v1, %v263_v39 }
 0x261   :  { %v267_v43 = vsel %vm266_vm5, %v263_v39, %v265_v6 }
 0x262   :  { %v270_v44 = vsel %vm268_vm6, %v269_v42, %v267_v43 }
 0x263   :  { %v272_v48 = vmul.f32 0.19866933, %v270_v44 }
 0x265   :  { %v273_v9 = vsub.f32 %v271_v47, %v272_v48 }
 0x267   :  { %v277_v50 = vsel %vm275_vm7, %v273_v9, %v346_v8 }
 0x268   :  { %v278_v49 = vsub.f32 %v277_v50, %v257_v33 }
 0x26a   :  { %v279_v51 = vmul.f32 %v344_v30, %v278_v49 }
 0x26c   :  { %v280_v52 = vadd.f32 %v279_v51, %v237_v31 }
 0x26e   :  { %v281_v53 = vmul.f32 30.0, %v280_v52 }
 0x270   :  { %v283_v54 = vsel %vm282_vm8, %v281_v53, -1e+30 }
 0x271   :  { %292 = vmax.xlane.f32.xlu0 %v283_v54  ;;  %v284_v55 = vpack.c.bf16 %v283_v54, %v283_v54 }
 0x273   :  { %285 = vst [vmem:[#allocation6] sm:$0xf] %v284_v55 }
 0x2fe   :  { %v293_v57 = vpop.xlane.xlu0 %292 }
 0x2ff   :  { %v295_v58 = vmax.f32 %v294_v56, %v293_v57 }
 0x301   :  { %v297_v59 = vsub.f32 %v294_v56, %v295_v58  ;;  %313 = vst.msk [vmem:[#allocation3] sm:$0xff] %vm34_vm4, %v295_v58  ;;  %303 = vperm.xlu0 %382, %v295_v58  }
 0x380   :  { %v304_v17 = vpop.permute.xlu0 %303 }
 0x381   :  { %v306_v16 = vsub.f32 %v283_v54, %v304_v17 }
 0x383   :  { %v307_v60 = vmul.f32 1.442695, %v306_v16 }
 0x385   :  { %419 = vpow2.f32 %v307_v60 }
 0x38f   :  { %v420_v61 = vpop.eup %419 }
 0x390   :  { %309 = vadd.xlane.f32.xlu1 %v420_v61 }
 0x394   :  { %258 = vadd.xlane.f32.xlu1 %v344_v30 }
 0x395   :  { %436 = shalt.err (!%p433_p4)
}
 0x396   :  { %s437_s27 = scalar_lea.hbm %s681_s3, 64 }
 0x397   :  { %p438_p5 = scmp.ne.s32.totalorder %s681_s3, %s437_s27  ;;  %p441_p6 = scmp.lt.u32.totalorder %s437_s27, %s681_s3 }
 0x399   :  { %p443_p7 = pnand %p441_p6, %p438_p5 }
 0x39b   :  { %446 = shalt.err (!%p443_p7)
}
 0x39c   :  { %334 = dma.vmem_to_hbm [thread:$0]  %s332_s23, 64, %s681_s3, [#allocation7]   ;;  %v298_v62 = vmul.f32 1.442695, %v297_v59  ;;  %v296_v3 = vld [vmem:[#allocation4] sm:$0xff]  ;;  %v287_v7 = vmul.f32 30.0, %v277_v50 }
 0x39d   :  { %v286_v23 = vld [vmem:[#allocation5] sm:$0xff]  ;;  %v317_v15 = vld [vmem:[#allocation3] sm:$0xff] }
 0x39e   :  { %421 = vpow2.f32 %v298_v62 }
 0x3a8   :  { %v422_v63 = vpop.eup %421 }
 0x3a9   :  { %v300_v40 = vmul.f32 %v422_v63, %v296_v3 }
 0x41d   :  { %v310_v4 = vpop.xlane.xlu1 %309 }
 0x41e   :  { %v311_v5 = vadd.f32 %v310_v4, %v300_v40 }
 0x420   :  { %312 = vst.msk [vmem:[#allocation4] sm:$0xff] %vm34_vm4, %v311_v5 }
 0x421   :  { %v259_v22 = vpop.xlane.xlu1 %258 }
 0x422   :  { %v288_v10 = vmul.f32 %v287_v7, %v259_v22 }
 0x424   :  { %v289_v11 = vadd.f32 %v288_v10, %v286_v23 }
 0x426   :  { %291 = vst.msk [vmem:[#allocation5] sm:$0xff] %vm34_vm4, %v289_v11 }
 0x427   :  { %v318_v12 = vld [vmem:[#allocation4] sm:$0xff] }
 0x428   :  { %423 = vlog2.f32 %v318_v12 }
 0x42d   :  { %v322_v29 = vld [vmem:[#allocation5] sm:$0xff] }
 0x432   :  { %v424_v13 = vpop.eup %423 }
 0x433   :  { %v320_v14 = vmul.f32 0.6931472, %v424_v13 }
 0x435   :  { %v321_v18 = vadd.f32 %v320_v14, %v317_v15 }
 0x437   :  { %v323_v28 = vsub.f32 %v321_v18, %v322_v29 }
 0x439   :  { %324 = vst.msk [vmem:[%s682_s4] sm:$0xff] %vm34_vm4, %v323_v28 }
 0x43a   :  { %447 = dma.done.wait [#allocation7], 64  }
 0x43b   :  { %448 = vsyncadd [#allocation7], 4294967232 }
 0x43c   :  { %342 = vsyncpa [#allocation7], 1 }

</bundles_post_ra>
